<compile_context>
chip_gen: v6e
topology: v6e:2x2x1
jax: 0.10.0
libtpu: 0.0.40
codegen_flags: <defaults>
</compile_context>

<pallas_src>
import functools

import jax
import jax.numpy as jnp
from jax.experimental import pallas as pl
from jax.experimental.pallas import tpu as pltpu

HIDDEN = 128            # fixed by the PyTorch module (Block(in_dim, 128))
LANE = 128
SUBLANE = 8
ROW_TILE_CAP = 2048
X_TILE_TARGET_BYTES = 4 * 1024 * 1024     # ~4 MiB x-tiles amortize per-step overhead
VMEM_BUDGET_BYTES = 40 * 1024 * 1024      # leave headroom under v7x's 64 MiB physical VMEM
VMEM_LIMIT_BYTES = 48 * 1024 * 1024


def _round_up(x, m):
    return (x + m - 1) // m * m


# ---------------------------------------------------------------------------
# Pallas kernel: fused MLP (Linear+ReLU blocks, then final Linear) for one
# (view, row-tile) grid point.  Weights are already (in_dim, out_dim), bf16.
# ---------------------------------------------------------------------------
def _dbonet_mlp_kernel(x_ref, w1_ref, wr_ref, b_ref, out_ref):
    n_rest = wr_ref.shape[0]          # static: remaining (128,128) layers incl. final

    # Layer 1: (TILE_N, F_pad) @ (F_pad, 128) -- bf16 operands, f32 accumulate
    h32 = jnp.dot(x_ref[...], w1_ref[...], preferred_element_type=jnp.float32)
    h32 = jnp.maximum(h32 + b_ref[0], 0.0)          # f32 bias + ReLU

    # Hidden Linear(128,128) + ReLU layers
    for layer in range(n_rest - 1):
        h = h32.astype(jnp.bfloat16)
        h32 = jnp.dot(h, wr_ref[layer], preferred_element_type=jnp.float32)
        h32 = jnp.maximum(h32 + b_ref[layer + 1], 0.0)

    # Final Linear(128, n_clusters) -- output columns padded to 128 lanes
    h = h32.astype(jnp.bfloat16)
    out = jnp.dot(h, wr_ref[n_rest - 1], preferred_element_type=jnp.float32) + b_ref[n_rest]
    # bf16 store: lane-dense, unmasked vst, half the HBM writeback of f32.
    out_ref[...] = out.astype(out_ref.dtype)


def dbonet_mlp_all_views(x_all, w1_all, wr_all, b_all, tile_n):
    """x_all: (V, N_pad, F_pad) bf16; w1_all: (V, F_pad, 128) bf16;
    wr_all: (V, R, 128, 128) bf16; b_all: (V, R+1, 1, 128) f32."""
    n_view, n_pad, f_pad = x_all.shape
    n_rest = wr_all.shape[1]
    grid = (n_view, n_pad // tile_n)

    flops = 2 * n_view * n_pad * (f_pad * HIDDEN + n_rest * HIDDEN * HIDDEN)
    bytes_accessed = (x_all.size * 2 + w1_all.size * 2 + wr_all.size * 2
                      + b_all.size * 4 + n_view * n_pad * HIDDEN * 2)

    return pl.pallas_call(
        _dbonet_mlp_kernel,
        out_shape=jax.ShapeDtypeStruct((n_view, n_pad, HIDDEN), jnp.bfloat16),
        grid_spec=pltpu.PrefetchScalarGridSpec(
            num_scalar_prefetch=0,
            grid=grid,
            in_specs=[
                # features: new row tile each i, new view each v
                pl.BlockSpec((pl.Squeezed(), tile_n, f_pad),
                             lambda v, i: (v, i, 0)),
                # first-layer weight: resident across row tiles of a view
                pl.BlockSpec((pl.Squeezed(), f_pad, HIDDEN),
                             lambda v, i: (v, 0, 0)),
                # remaining weights stacked (R, 128, 128), resident across row tiles
                pl.BlockSpec((pl.Squeezed(), wr_all.shape[1], HIDDEN, HIDDEN),
                             lambda v, i: (v, 0, 0, 0)),
                # biases stacked (R+1, 1, 128), f32, resident across row tiles
                pl.BlockSpec((pl.Squeezed(), b_all.shape[1], 1, HIDDEN),
                             lambda v, i: (v, 0, 0, 0)),
            ],
            out_specs=pl.BlockSpec((pl.Squeezed(), tile_n, HIDDEN),
                                   lambda v, i: (v, i, 0)),
        ),
        compiler_params=pltpu.CompilerParams(
            # Both axes parallel: megacore (v7x) splits the flattened parallel
            # iteration space; inner row axis keeps weights resident per view.
            dimension_semantics=("parallel", "parallel"),
            vmem_limit_bytes=VMEM_LIMIT_BYTES,
        ),
        cost_estimate=pl.CostEstimate(flops=int(flops), transcendentals=0,
                                      bytes_accessed=int(bytes_accessed)),
    )(x_all, w1_all, wr_all, b_all)


# ---------------------------------------------------------------------------
# Row-tile selection: ~4 MiB x-tiles, VMEM-guarded (v7x 64 MiB), minimal
# row padding (n_pad - n8 <= 8 * num_tiles instead of up to ~2x).
# ---------------------------------------------------------------------------
def _choose_row_tile(n8, f_pad):
    # bytes that scale with tile_n: double-buffered bf16 x + bf16 out + f32 temps
    per_row = 2 * f_pad * 2 + 2 * HIDDEN * 2 + 2 * HIDDEN * 4
    # tile_n-independent bytes: double-buffered w1 + wr + b
    fixed = 2 * (f_pad * HIDDEN * 2 + 3 * HIDDEN * HIDDEN * 2 + 4 * HIDDEN * 4)
    vmem_cap = max((VMEM_BUDGET_BYTES - fixed) // per_row, SUBLANE)
    target = max(X_TILE_TARGET_BYTES // (2 * f_pad), SUBLANE)
    max_tile = max(min(target, vmem_cap, ROW_TILE_CAP) // SUBLANE * SUBLANE, SUBLANE)
    if n8 <= max_tile:
        return n8, n8                      # single tile, zero extra row padding
    num_tiles = pl.cdiv(n8, max_tile)
    tile_n = _round_up(pl.cdiv(n8, num_tiles), SUBLANE)
    return tile_n, tile_n * num_tiles


# ---------------------------------------------------------------------------
# Host-side parameter packing (done ONCE at init): pre-transpose to (in, out),
# pad to lane multiples, bf16 cast, stack per feature-width bucket.
# ---------------------------------------------------------------------------
def _pack_view_params(view_layers, f_pad):
    # view_layers: [(w, b), ...] in PyTorch (out_dim, in_dim) layout; the last
    # entry is the final Linear(128, n_clusters), the rest are Block layers.
    (w1, _b1) = view_layers[0]
    rest = view_layers[1:]
    (w_last, b_last) = rest[-1]
    n_clusters = w_last.shape[0]

    w1_t = jnp.zeros((f_pad, HIDDEN), jnp.float32).at[:w1.shape[1], :].set(w1.T)
    w_last_t = jnp.zeros((HIDDEN, HIDDEN), jnp.float32).at[:, :n_clusters].set(w_last.T)
    wr = jnp.stack([w.T for (w, _) in rest[:-1]] + [w_last_t], axis=0)

    b_last_p = jnp.zeros((HIDDEN,), jnp.float32).at[:n_clusters].set(b_last)
    b = jnp.stack([view_layers[0][1]] + [b for (_, b) in rest[:-1]] + [b_last_p],
                  axis=0).reshape(len(view_layers), 1, HIDDEN)

    return w1_t.astype(jnp.bfloat16), wr.astype(jnp.bfloat16), b


def pack_dbonet_params(params):
    """Group views by their own padded feature width (no padding to the global
    max) and pre-pack weights once per bucket."""
    blocks = params["blocks"]
    buckets = {}
    for v, view_layers in enumerate(blocks):
        nfeat = view_layers[0][0].shape[1]
        f_pad = _round_up(nfeat, LANE)
        buckets.setdefault(f_pad, []).append(v)
    packed = []
    for f_pad in sorted(buckets):
        view_ids = buckets[f_pad]
        per = [_pack_view_params(blocks[v], f_pad) for v in view_ids]
        packed.append(dict(
            view_ids=tuple(view_ids),
            f_pad=f_pad,
            w1=jnp.stack([p[0] for p in per]),
            wr=jnp.stack([p[1] for p in per]),
            b=jnp.stack([p[2] for p in per]),
        ))
    return packed


# ---------------------------------------------------------------------------
# Parameter construction (deterministic, mirrors DBONet.__init__ shapes).
# ---------------------------------------------------------------------------
def init_dbonet_params(key, nfeats, n_view, n_clusters, blocks=3, n_samples=100):
    params = {"blocks": [], "U": [], "Z": None}
    for v in range(n_view):
        layer_dims = []
        in_dim = nfeats[v]
        for _ in range(blocks):
            layer_dims.append((in_dim, HIDDEN))
            in_dim = HIDDEN
        layer_dims.append((HIDDEN, n_clusters))

        view_layers = []
        for (din, dout) in layer_dims:
            key, kw, kb = jax.random.split(key, 3)
            bound = 1.0 / jnp.sqrt(jnp.float32(din))
            w = jax.random.uniform(kw, (dout, din), jnp.float32, -bound, bound)
            b = jax.random.uniform(kb, (dout,), jnp.float32, -bound, bound)
            view_layers.append((w, b))
        params["blocks"].append(view_layers)

        key, ku = jax.random.split(key)
        params["U"].append(jax.random.normal(ku, (n_clusters, nfeats[v]), jnp.float32))

    key, kz = jax.random.split(key)
    params["Z"] = jax.random.normal(kz, (n_samples, n_clusters), jnp.float32)
    # Pack / transpose / bf16-cast weights once at init (cached for forward).
    params["packed"] = pack_dbonet_params(params)
    return params


# ---------------------------------------------------------------------------
# Per-bucket forward: pads/stacks features (fused under jit), runs the fused
# kernel, slices real rows / columns back out as f32.
# ---------------------------------------------------------------------------
@functools.partial(jax.jit, static_argnames=("tile_n", "n_pad", "n_clusters"))
def _bucket_forward(feats, w1_all, wr_all, b_all, *, tile_n, n_pad, n_clusters):
    f_pad = w1_all.shape[1]
    n = feats[0].shape[0]
    x_all = jnp.stack([
        jnp.zeros((n_pad, f_pad), jnp.bfloat16)
           .at[:n, :f.shape[1]].set(f.astype(jnp.bfloat16))
        for f in feats])
    out = dbonet_mlp_all_views(x_all, w1_all, wr_all, b_all, tile_n)
    return [out[i, :n, :n_clusters].astype(jnp.float32) for i in range(len(feats))]


# ---------------------------------------------------------------------------
# DBONet.forward equivalent.
# ---------------------------------------------------------------------------
def dbonet_forward(params, features, adjs=None, return_H=False):
    # adjs / U are not used by DBONet.forward in the reference module either.
    if not return_H:
        return params["Z"]          # H_list unused -> skip all kernel work

    n_view = len(features)
    n = features[0].shape[0]
    assert all(f.shape[0] == n for f in features)
    n_clusters = params["blocks"][0][-1][0].shape[0]
    assert n_clusters <= HIDDEN  # TODO(synk): tile the output dim if n_clusters > 128

    if "packed" not in params:
        params["packed"] = pack_dbonet_params(params)

    n8 = _round_up(n, SUBLANE)
    H_list = [None] * n_view
    for bucket in params["packed"]:
        tile_n, n_pad = _choose_row_tile(n8, bucket["f_pad"])
        feats_b = [features[v] for v in bucket["view_ids"]]
        outs = _bucket_forward(feats_b, bucket["w1"], bucket["wr"], bucket["b"],
                               tile_n=tile_n, n_pad=n_pad, n_clusters=n_clusters)
        for v, h in zip(bucket["view_ids"], outs):
            H_list[v] = h

    return params["Z"], H_list


# Pure-JAX reference with the same bf16-MXU / f32-elementwise / bf16-store numerics.
def _ref_forward_bf16(x, view_layers):
    (w1, b1), (w2, b2), (w3, b3), (w4, b4) = view_layers
    h = x.astype(jnp.bfloat16)
    for (w, b) in ((w1, b1), (w2, b2), (w3, b3)):
        acc = jnp.dot(h, w.T.astype(jnp.bfloat16), preferred_element_type=jnp.float32)
        h = jnp.maximum(acc + b, 0.0).astype(jnp.bfloat16)
    out = jnp.dot(h, w4.T.astype(jnp.bfloat16), preferred_element_type=jnp.float32) + b4
    return out.astype(jnp.bfloat16).astype(jnp.float32)   # mirror kernel's bf16 store


if __name__ == "__main__":
    # small shapes consistent with the module
    n_view = 2
    nfeats = [16, 32]
    n_clusters = 8
    n_samples = 8  # rows of each feature matrix

    key = jax.random.PRNGKey(0)
    key, kp = jax.random.split(key)
    params = init_dbonet_params(kp, nfeats, n_view, n_clusters,
                                blocks=3, n_samples=100)

    feats = []
    for v in range(n_view):
        key, kf = jax.random.split(key)
        feats.append(jax.random.normal(kf, (n_samples, nfeats[v]), jnp.float32))

    # return_H=False path: returns Z unchanged, no kernel launched.
    Z_only = jax.block_until_ready(dbonet_forward(params, feats, return_H=False))
    assert Z_only.shape == (100, n_clusters)

    Z, H_list = dbonet_forward(params, feats, return_H=True)
    Z = jax.block_until_ready(Z)
    H_list = [jax.block_until_ready(h) for h in H_list]

    # sanity: reference in plain JAX (same bf16 operand / f32 accumulate / bf16 store path)
    for v in range(n_view):
        ref = _ref_forward_bf16(feats[v], params["blocks"][v])
        assert H_list[v].shape == (n_samples, n_clusters)
        assert H_list[v].dtype == jnp.float32
        assert jnp.allclose(H_list[v], ref, atol=5e-3, rtol=1e-2), (
            float(jnp.max(jnp.abs(H_list[v] - ref))))
    assert Z.shape == (100, n_clusters)

    print("KERNEL_OK")
</pallas_src>

<mosaic_0001>
module attributes {stable_mosaic.version = 11 : i64} {
  func.func @_dbonet_mlp_kernel(%arg0: i32, %arg1: i32, %arg2: memref<1x8x128xbf16, #tpu.memory_space<vmem>>, %arg3: memref<1x128x128xbf16, #tpu.memory_space<vmem>>, %arg4: memref<1x3x128x128xbf16, #tpu.memory_space<vmem>>, %arg5: memref<1x4x1x128xf32, #tpu.memory_space<vmem>>, %arg6: memref<1x8x128xbf16, #tpu.memory_space<vmem>>) attributes {dimension_semantics = [#tpu.dimension_semantics<parallel>, #tpu.dimension_semantics<parallel>], iteration_bounds = array<i64: 2, 1>, scalar_prefetch = 0 : i64, scratch_operands = 0 : i64, tpu.core_type = #tpu.core_type<tc>, window_params = [{transform_indices = @transform_0, window_bounds = array<i64: 1, 8, 128>}, {transform_indices = @transform_1, window_bounds = array<i64: 1, 128, 128>}, {transform_indices = @transform_2, window_bounds = array<i64: 1, 3, 128, 128>}, {transform_indices = @transform_3, window_bounds = array<i64: 1, 4, 1, 128>}, {transform_indices = @transform_4, window_bounds = array<i64: 1, 8, 128>}]} {
    %c0 = arith.constant 0 : index
    %c0_0 = arith.constant 0 : index
    %c0_1 = arith.constant 0 : index
    %0 = vector.load %arg2[%c0, %c0_0, %c0_1] : memref<1x8x128xbf16, #tpu.memory_space<vmem>>, vector<1x8x128xbf16>
    %1 = vector.shape_cast %0 : vector<1x8x128xbf16> to vector<8x128xbf16>
    %c0_2 = arith.constant 0 : index
    %c0_3 = arith.constant 0 : index
    %c0_4 = arith.constant 0 : index
    %2 = vector.load %arg3[%c0_2, %c0_3, %c0_4] : memref<1x128x128xbf16, #tpu.memory_space<vmem>>, vector<1x128x128xbf16>
    %3 = vector.shape_cast %2 : vector<1x128x128xbf16> to vector<128x128xbf16>
    %cst = arith.constant dense<0.000000e+00> : vector<8x128xf32>
    %4 = tpu.matmul %1, %3, %cst {dimension_numbers = #tpu.dot_dimension_numbers<[1], [0], [0], [1], [0, 0, 1, 1], [], []>} : vector<8x128xbf16>, vector<128x128xbf16>, vector<8x128xf32> -> vector<8x128xf32>
    %c0_5 = arith.constant 0 : index
    %c0_6 = arith.constant 0 : index
    %c0_7 = arith.constant 0 : index
    %c0_8 = arith.constant 0 : index
    %5 = vector.load %arg5[%c0_5, %c0_6, %c0_7, %c0_8] : memref<1x4x1x128xf32, #tpu.memory_space<vmem>>, vector<1x1x1x128xf32>
    %6 = vector.shape_cast %5 : vector<1x1x1x128xf32> to vector<1x128xf32>
    %7 = vector.broadcast %6 : vector<1x128xf32> to vector<8x128xf32>
    %8 = arith.addf %4, %7 : vector<8x128xf32>
    %cst_9 = arith.constant 0.000000e+00 : f32
    %9 = vector.broadcast %cst_9 : f32 to vector<8x128xf32>
    %10 = arith.maximumf %8, %9 : vector<8x128xf32>
    %11 = arith.truncf %10 : vector<8x128xf32> to vector<8x128xbf16>
    %c0_10 = arith.constant 0 : index
    %c0_11 = arith.constant 0 : index
    %c0_12 = arith.constant 0 : index
    %c0_13 = arith.constant 0 : index
    %12 = vector.load %arg4[%c0_10, %c0_11, %c0_12, %c0_13] : memref<1x3x128x128xbf16, #tpu.memory_space<vmem>>, vector<1x1x128x128xbf16>
    %13 = vector.shape_cast %12 : vector<1x1x128x128xbf16> to vector<128x128xbf16>
    %cst_14 = arith.constant dense<0.000000e+00> : vector<8x128xf32>
    %14 = tpu.matmul %11, %13, %cst_14 {dimension_numbers = #tpu.dot_dimension_numbers<[1], [0], [0], [1], [0, 0, 1, 1], [], []>} : vector<8x128xbf16>, vector<128x128xbf16>, vector<8x128xf32> -> vector<8x128xf32>
    %c0_15 = arith.constant 0 : index
    %c1 = arith.constant 1 : index
    %c0_16 = arith.constant 0 : index
    %c0_17 = arith.constant 0 : index
    %15 = vector.load %arg5[%c0_15, %c1, %c0_16, %c0_17] : memref<1x4x1x128xf32, #tpu.memory_space<vmem>>, vector<1x1x1x128xf32>
    %16 = vector.shape_cast %15 : vector<1x1x1x128xf32> to vector<1x128xf32>
    %17 = vector.broadcast %16 : vector<1x128xf32> to vector<8x128xf32>
    %18 = arith.addf %14, %17 : vector<8x128xf32>
    %cst_18 = arith.constant 0.000000e+00 : f32
    %19 = vector.broadcast %cst_18 : f32 to vector<8x128xf32>
    %20 = arith.maximumf %18, %19 : vector<8x128xf32>
    %21 = arith.truncf %20 : vector<8x128xf32> to vector<8x128xbf16>
    %c0_19 = arith.constant 0 : index
    %c1_20 = arith.constant 1 : index
    %c0_21 = arith.constant 0 : index
    %c0_22 = arith.constant 0 : index
    %22 = vector.load %arg4[%c0_19, %c1_20, %c0_21, %c0_22] : memref<1x3x128x128xbf16, #tpu.memory_space<vmem>>, vector<1x1x128x128xbf16>
    %23 = vector.shape_cast %22 : vector<1x1x128x128xbf16> to vector<128x128xbf16>
    %cst_23 = arith.constant dense<0.000000e+00> : vector<8x128xf32>
    %24 = tpu.matmul %21, %23, %cst_23 {dimension_numbers = #tpu.dot_dimension_numbers<[1], [0], [0], [1], [0, 0, 1, 1], [], []>} : vector<8x128xbf16>, vector<128x128xbf16>, vector<8x128xf32> -> vector<8x128xf32>
    %c0_24 = arith.constant 0 : index
    %c2 = arith.constant 2 : index
    %c0_25 = arith.constant 0 : index
    %c0_26 = arith.constant 0 : index
    %25 = vector.load %arg5[%c0_24, %c2, %c0_25, %c0_26] : memref<1x4x1x128xf32, #tpu.memory_space<vmem>>, vector<1x1x1x128xf32>
    %26 = vector.shape_cast %25 : vector<1x1x1x128xf32> to vector<1x128xf32>
    %27 = vector.broadcast %26 : vector<1x128xf32> to vector<8x128xf32>
    %28 = arith.addf %24, %27 : vector<8x128xf32>
    %cst_27 = arith.constant 0.000000e+00 : f32
    %29 = vector.broadcast %cst_27 : f32 to vector<8x128xf32>
    %30 = arith.maximumf %28, %29 : vector<8x128xf32>
    %31 = arith.truncf %30 : vector<8x128xf32> to vector<8x128xbf16>
    %c0_28 = arith.constant 0 : index
    %c2_29 = arith.constant 2 : index
    %c0_30 = arith.constant 0 : index
    %c0_31 = arith.constant 0 : index
    %32 = vector.load %arg4[%c0_28, %c2_29, %c0_30, %c0_31] : memref<1x3x128x128xbf16, #tpu.memory_space<vmem>>, vector<1x1x128x128xbf16>
    %33 = vector.shape_cast %32 : vector<1x1x128x128xbf16> to vector<128x128xbf16>
    %cst_32 = arith.constant dense<0.000000e+00> : vector<8x128xf32>
    %34 = tpu.matmul %31, %33, %cst_32 {dimension_numbers = #tpu.dot_dimension_numbers<[1], [0], [0], [1], [0, 0, 1, 1], [], []>} : vector<8x128xbf16>, vector<128x128xbf16>, vector<8x128xf32> -> vector<8x128xf32>
    %c0_33 = arith.constant 0 : index
    %c3 = arith.constant 3 : index
    %c0_34 = arith.constant 0 : index
    %c0_35 = arith.constant 0 : index
    %35 = vector.load %arg5[%c0_33, %c3, %c0_34, %c0_35] : memref<1x4x1x128xf32, #tpu.memory_space<vmem>>, vector<1x1x1x128xf32>
    %36 = vector.shape_cast %35 : vector<1x1x1x128xf32> to vector<1x128xf32>
    %37 = vector.broadcast %36 : vector<1x128xf32> to vector<8x128xf32>
    %38 = arith.addf %34, %37 : vector<8x128xf32>
    %39 = arith.truncf %38 : vector<8x128xf32> to vector<8x128xbf16>
    %c0_36 = arith.constant 0 : index
    %c0_37 = arith.constant 0 : index
    %c0_38 = arith.constant 0 : index
    %40 = vector.load %arg6[%c0_36, %c0_37, %c0_38] : memref<1x8x128xbf16, #tpu.memory_space<vmem>>, vector<1x8x128xbf16>
    %41 = vector.shape_cast %40 : vector<1x8x128xbf16> to vector<8x128xbf16>
    %42 = vector.shape_cast %39 : vector<8x128xbf16> to vector<1x8x128xbf16>
    tpu.vector_store %arg6[%c0_36, %c0_37, %c0_38], %42 {strides = array<i32>} : memref<1x8x128xbf16, #tpu.memory_space<vmem>>, vector<1x8x128xbf16>,
    return
  }
  func.func @transform_0(%arg0: i32, %arg1: i32) -> (i32, i32, i32) {
    %c0_i32 = arith.constant 0 : i32
    %c0_i32_0 = arith.constant 0 : i32
    return %arg0, %arg1, %c0_i32 : i32, i32, i32
  }
  func.func @transform_1(%arg0: i32, %arg1: i32) -> (i32, i32, i32) {
    %c0_i32 = arith.constant 0 : i32
    %c0_i32_0 = arith.constant 0 : i32
    %c0_i32_1 = arith.constant 0 : i32
    return %arg0, %c0_i32, %c0_i32_0 : i32, i32, i32
  }
  func.func @transform_2(%arg0: i32, %arg1: i32) -> (i32, i32, i32, i32) {
    %c0_i32 = arith.constant 0 : i32
    %c0_i32_0 = arith.constant 0 : i32
    %c0_i32_1 = arith.constant 0 : i32
    %c0_i32_2 = arith.constant 0 : i32
    return %arg0, %c0_i32, %c0_i32_0, %c0_i32_1 : i32, i32, i32, i32
  }
  func.func @transform_3(%arg0: i32, %arg1: i32) -> (i32, i32, i32, i32) {
    %c0_i32 = arith.constant 0 : i32
    %c0_i32_0 = arith.constant 0 : i32
    %c0_i32_1 = arith.constant 0 : i32
    %c0_i32_2 = arith.constant 0 : i32
    return %arg0, %c0_i32, %c0_i32_0, %c0_i32_1 : i32, i32, i32, i32
  }
  func.func @transform_4(%arg0: i32, %arg1: i32) -> (i32, i32, i32) {
    %c0_i32 = arith.constant 0 : i32
    %c0_i32_0 = arith.constant 0 : i32
    return %arg0, %arg1, %c0_i32 : i32, i32, i32
  }
}

</mosaic_0001>

<bundles_post_ra>
// kernel: _bucket_forward.1
= control target key start
LH: loop header
LB: loop body
LE: loop exit
PB: predicated region body
PF: predicated region fallthrough
CT: control target
= control target key end

     0   :  { %9 = vsyncpa [#allocation3], 0  ;;  %s1581_s0 = inlined_call_operand.vmem [shape: bf16[2,8,128], index: 0, kind: input, shape index: {}]   ;;  %s1582_s1 = inlined_call_operand.hbm [shape: bf16[2,128,128], index: 1, kind: input, shape index: {}]   ;;  %s1583_s2 = inlined_call_operand.hbm [shape: bf16[2,3,128,128], index: 2, kind: input, shape index: {}]   ;;  %s1584_s3 = inlined_call_operand.vmem [shape: f32[2,4,1,128], index: 3, kind: input, shape index: {}]   ;;  %s1585_s4 = inlined_call_operand.vmem [shape: bf16[2,8,128], index: 4, kind: output, shape index: {}]  }
   0x1   :  { %11 = vsyncpa [#allocation3 + $0x1], 0 }
   0x2   :  { %12 = vsyncpa [#allocation5], 0 }
   0x3   :  { %14 = vsyncpa [#allocation5 + $0x1], 0  ;;  %s1358_s15 = smov 0   ;;  %s1360_s16 = smov 0  }
   0x4   :  { %s1362_s17 = smov 0   ;;  %s1364_s18 = smov 0  }
   0x5   :  { %s1366_s19 = smov 0   ;;  %s1368_s20 = smov 0  }
   0x6 LB: > { %s913_s21 = sadd.s32 4294967295, %s1325_s20   ;;  %s32_s22 = sadd.s32 1, %s1321_s19  ;;  %s1325_s20 = sphi %s1368_s20, %s20_s20   ;;  %s1321_s19 = sphi %s1366_s19, %s1594_s19   ;;  %s1317_s18 = sphi %s1364_s18, %s1593_s18   ;;  %s1313_s17 = sphi %s1362_s17, %s1592_s17   ;;  %s1309_s16 = sphi %s1360_s16, %s1591_s16   ;;  %s1305_s15 = sphi %s1358_s15, %s1590_s15  }
   0x7   : > { %p34_p0 = scmp.ge.s32.totalorder %s32_s22, 2  ;;  %s67_s23 = sadd.s32 1, %s1313_s17 }
   0x8   : > { %p74_p1 = scmp.ne.s32.totalorder %s1313_s17, %s1309_s16  ;;  %p75_p2 = scmp.eq.s32.totalorder %s1325_s20, 0 }
   0x9   : > { %s1596_s22 = smov (%p34_p0, %s32_s22), 0  ;;  %p80_p4 = scmp.ne.s32.totalorder %s1309_s16, %s1305_s15 }
   0xa   : > { %p1394_p3 = por %p75_p2, %p74_p1  ;;  %s64_s25 = ssub.s32 %s1321_s19, %s1596_s22 }
   0xb   : > { %p81_p5 = scmp.eq.s32.totalorder %s913_s21, 0  ;;  %p65_p6 = scmp.eq.s32.totalorder %s64_s25, 0 }
   0xc   : > { %p1130_p8 = scmp.lt.s32.totalorder %s1325_s20, 2  ;;  %s1410_s28 = sand.u32 1, %s1313_s17  }
   0xd   : > { %p1401_p7 = por %p81_p5, %p80_p4  ;;  %s999_s29 = sshll.u32 %s1321_s19, 10 }
   0xe   : > { %s1407_s27 = scalar_select %p65_p6, %s1313_s17, %s67_s23  }
   0xf   : > { %s917_s30 = sshll.u32 %s1410_s28, 6  ;;  %s204_s7 = scalar_lea.hbm %s1582_s1, %s999_s29 }
  0x10   : > { %s198_s8 = scalar_lea.vmem [#allocation2], %s917_s30  ;;  %p1419_p9 = pnand %p1130_p8, %p1394_p3 }
  0x11   : > { %s205_s9 = sshll.u32 %s198_s8, 4  ;;  %s195_s11 = scalar_lea.sflag [#allocation3], %s1410_s28  ;;  %s206_s9 = int_to_ptr.vmem [resolvable:$true] %s205_s9 }
  0x12   : > { %p1217_p10 = pneg %p1419_p9  ;;  %s1228_s12 = scalar_lea.vmem %s206_s9, 1024 }
  0x13   : > { %p1229_p11 = scmp.ne.s32.totalorder %s206_s9, %s1228_s12  ;;  %s1327_s13 = smov [#allocation2]  }
  0x14   : > { %s1233_s14 = sshll.u32 %s1327_s13, 4  ;;  %s1234_s14 = int_to_ptr.vmem [resolvable:$false] %s1233_s14 }
  0x15   : > { %p1231_p12 = pnand %p1229_p11, %p1217_p10  ;;  %s1235_s15 = scalar_lea.vmem %s1234_s14, 2048 }
  0x16   : > { %p1236_p0 = scmp.lt.s32.totalorder %s206_s9, %s1234_s14  ;;  %p1237_p1 = scmp.lt.s32.totalorder %s1235_s15, %s1228_s12 }
  0x17   : > { %p1232_p13 = pneg %p1231_p12 }
  0x18   : > { %p1238_p2 = por %p1237_p1, %p1236_p0 }
  0x1a   : > { %p1239_p3 = pnand %p1238_p2, %p1232_p13 }
  0x1c   : > { %1242 = shalt.err (!%p1239_p3)
}
  0x1d   : > { %s1328_s21 = smov 64   ;;  %s1329_s23 = smov 4  }
  0x1e   : > { %1126 = dma.hbm_to_vmem [thread:$0]  (!%p1419_p9), %s204_s7, 1024, %s206_s9, %s195_s11, %s1328_s21, %s1328_s21, %s1329_s23  }
  0x1f   : > { %p921_p4 = scmp.ge.s32.totalorder %s1325_s20, 1  ;;  %p241_p5 = scmp.lt.s32.totalorder %s1325_s20, 3 }
  0x20   : > { %s1116_s24 = smul.u32 192, %s1410_s28  ;;  %s216_s13 = scalar_lea.sflag [#allocation5], %s1410_s28 }
  0x21   : > { %p1437_p6 = pnand %p921_p4, %p241_p5  ;;  %s1117_s29 = smul.u32 3072, %s1321_s19 }
  0x22   : > { %s219_s8 = scalar_lea.vmem [#allocation4], %s1116_s24  ;;  %s1330_s7 = smov [#allocation4]  }
  0x23   : > { %s225_s6 = scalar_lea.hbm %s1583_s2, %s1117_s29  ;;  %s226_s12 = sshll.u32 %s219_s8, 4  ;;  %s227_s12 = int_to_ptr.vmem [resolvable:$true] %s226_s12 }
  0x24   : > { %s1256_s14 = scalar_lea.vmem %s227_s12, 3072  ;;  %s1261_s9 = sshll.u32 %s1330_s7, 4  ;;  %s1262_s9 = int_to_ptr.vmem [resolvable:$false] %s1261_s9 }
  0x25   : > { %p1257_p8 = scmp.ne.s32.totalorder %s227_s12, %s1256_s14  ;;  %s1263_s11 = scalar_lea.vmem %s1262_s9, 6144 }
  0x26   : > { %p1264_p13 = scmp.lt.s32.totalorder %s227_s12, %s1262_s9  ;;  %p1265_p0 = scmp.lt.s32.totalorder %s1263_s11, %s1256_s14 }
  0x27   : > { %p1259_p11 = pnand %p1257_p8, %p1217_p10 }
  0x28   : > { %p1266_p1 = por %p1265_p0, %p1264_p13 }
  0x29   : > { %p1260_p12 = pneg %p1259_p11 }
  0x2b   : > { %p1267_p2 = pnand %p1266_p1, %p1260_p12 }
  0x2d   : > { %1270 = shalt.err (!%p1267_p2)
}
  0x2e   : > { %1129 = dma.hbm_to_vmem [thread:$0]  (!%p1419_p9), %s225_s6, 3072, %s227_s12, %s216_s13, %s1328_s21, %s1328_s21, %s1329_s23  }
  0x2f   : > { %245 = sbr.rel (%p1437_p6) target bundleno = 887 (0x377), region = 36  ;;  %s247_s28 = sand.u32 (!%p1437_p6), 1, %s1309_s16  }
  0x30   : > { %s922_s15 = sshll.u32 (!%p1437_p6), %s247_s28, 6  ;;  %s248_s24 = scalar_lea.sflag (!%p1437_p6), [#allocation3], %s247_s28 }
  0x31   : > { %s1457_s29 = scalar_lea.vmem (!%p1437_p6), [#allocation2], %s922_s15 }
  0x34   : > { %1296 = dma.done.wait (%p1401_p7), %s248_s24, 1024  }
  0x35   : > { %1298 = vsyncadd (%p1401_p7), %s248_s24, 4294966272  ;;  %s1118_s10 = smul.u32 192, %s247_s28  ;;  %s257_s30 = scalar_lea.sflag [#allocation5], %s247_s28 }
  0x37   : > { %s1463_s5 = scalar_lea.vmem [#allocation4], %s1118_s10 }
  0x38   : > { %1300 = dma.done.wait (%p1401_p7), %s257_s30, 3072  }
  0x39   : > { %1302 = vsyncadd (%p1401_p7), %s257_s30, 4294964224  ;;  %v1331_v0 = vmov 0.0   ;;  %vm1332_vm0 = vmmov 0   ;;  %v1183_v1 = vld [vmem:[%s1457_s29 + $0x38] sm:$0xff]   ;;  %v1184_v2 = vld [vmem:[%s1457_s29 + $0x30] sm:$0xff]   ;;  %p303_p7 = scmp.lt.s32.totalorder %s1317_s18, 1 }
  0x3a   : > { %1036 = vmatprep.subr.bf16.mxu0 %v1331_v0  ;;  %1052 = vmatprep.mubr.msk.bf16.mxu0 %vm1332_vm0, %v1331_v0  ;;  %v1185_v3 = vld [vmem:[%s1457_s29 + $0x28] sm:$0xff]   ;;  %v1191_v4 = vld [vmem:[%s1463_s5 + $0x38] sm:$0xff]   ;;  %v1186_v5 = vld [vmem:[%s1457_s29 + $0x20] sm:$0xff]  }
  0x3b   : > { %1056 = vmatprep.subr.bf16.mxu1 %v1331_v0  ;;  %1072 = vmatprep.mubr.msk.bf16.mxu1 %vm1332_vm0, %v1331_v0  ;;  %s1598_s18 = smov (!%p303_p7, %s1317_s18), 1  ;;  %v1192_v6 = vld [vmem:[%s1463_s5 + $0x30] sm:$0xff]   ;;  %v1187_v7 = vld [vmem:[%s1457_s29 + $0x18] sm:$0xff]   ;;  %v1193_v8 = vld [vmem:[%s1463_s5 + $0x28] sm:$0xff]  }
  0x3c   : > { %1037 = vmatpush3.bf16.msra.mxu0 %v1183_v1  ;;  %1057 = vmatpush3.bf16.msra.mxu1 %v1191_v4  ;;  %s1488_s26 = sshll.u32 %s1598_s18, 2  ;;  %v1188_v9 = vld [vmem:[%s1457_s29 + $0x10] sm:$0xff]   ;;  %v1194_v10 = vld [vmem:[%s1463_s5 + $0x20] sm:$0xff]   ;;  %v1189_v11 = vld [vmem:[%s1457_s29 + $0x8] sm:$0xff]  }
  0x3d   : > { %1038 = vmatprep.subr.bf16.mxu0 %v1331_v0  ;;  %1058 = vmatprep.subr.bf16.mxu1 %v1331_v0  ;;  %v1195_v12 = vld [vmem:[%s1463_s5 + $0x18] sm:$0xff]   ;;  %v1190_v13 = vld [vmem:[%s1457_s29] sm:$0xff]   ;;  %s309_s23 = scalar_lea.vmem %s1581_s0, %s1488_s26  ;;  %v1196_v14 = vld [vmem:[%s1463_s5 + $0x10] sm:$0xff]   ;;  %s1533_s8 = scalar_lea.vmem %s1584_s3, %s1488_s26 }
  0x3e   : > { %v322_v15 = vld [vmem:[%s309_s23] sm:$0xf]  ;;  %v1197_v16 = vld [vmem:[%s1463_s5 + $0x8] sm:$0xff]   ;;  %v1199_v18 = vld [vmem:[%s1463_s5 + $0x78] sm:$0xff]   ;;  %s320_s14 = scalar_lea.vmem %s1585_s4, %s1488_s26 }
  0x3f   : > { %v1198_v17 = vld [vmem:[%s1463_s5] sm:$0xff]   ;;  %v1200_v19 = vld [vmem:[%s1463_s5 + $0x70] sm:$0xff]   ;;  %v1201_v20 = vld [vmem:[%s1463_s5 + $0x68] sm:$0xff]  }
  0x40   : > { %1039 = vmatpush3.bf16.msra.mxu0 %v1184_v2  ;;  %1059 = vmatpush3.bf16.msra.mxu1 %v1192_v6  ;;  %v1202_v21 = vld [vmem:[%s1463_s5 + $0x60] sm:$0xff]   ;;  %v1203_v22 = vld [vmem:[%s1463_s5 + $0x58] sm:$0xff]   ;;  %v1204_v23 = vld [vmem:[%s1463_s5 + $0x50] sm:$0xff]  }
  0x41   : > { %1040 = vmatprep.subr.bf16.mxu0 %v1331_v0  ;;  %1060 = vmatprep.subr.bf16.mxu1 %v1331_v0  ;;  %v926_v24 = vld [vmem:[%s1533_s8] ss:$0 sm:$0xff]  ;;  %v1205_v32 = vld [vmem:[%s1463_s5 + $0x48] sm:$0xff]   ;;  %v1207_v34 = vld [vmem:[%s1463_s5 + $0xb8] sm:$0xff]  }
  0x42   : > { %v1206_v33 = vld [vmem:[%s1463_s5 + $0x40] sm:$0xff]   ;;  %v1208_v35 = vld [vmem:[%s1463_s5 + $0xb0] sm:$0xff]   ;;  %v1209_v36 = vld [vmem:[%s1463_s5 + $0xa8] sm:$0xff]  }
  0x43   : > { %v1210_v37 = vld [vmem:[%s1463_s5 + $0xa0] sm:$0xff]   ;;  %v1211_v38 = vld [vmem:[%s1463_s5 + $0x98] sm:$0xff]   ;;  %v1212_v39 = vld [vmem:[%s1463_s5 + $0x90] sm:$0xff]  }
  0x44   : > { %1041 = vmatpush3.bf16.msra.mxu0 %v1185_v3  ;;  %1061 = vmatpush3.bf16.msra.mxu1 %v1193_v8  ;;  %v936_v40 = vld [vmem:[%s1533_s8 + $0x1] ss:$0 sm:$0xff]  ;;  %v1213_v48 = vld [vmem:[%s1463_s5 + $0x88] sm:$0xff]   ;;  %v962_v50 = vld [vmem:[%s1533_s8 + $0x2] ss:$0 sm:$0xff] }
  0x45   : > { %1042 = vmatprep.subr.bf16.mxu0 %v1331_v0  ;;  %1062 = vmatprep.subr.bf16.mxu1 %v1331_v0  ;;  %v1214_v49 = vld [vmem:[%s1463_s5 + $0x80] sm:$0xff]  }
  0x46   : > { %v988_v58 = vld [vmem:[%s1533_s8 + $0x3] ss:$0 sm:$0xff] }
  0x48   : > { %1043 = vmatpush3.bf16.msra.mxu0 %v1186_v5  ;;  %1063 = vmatpush3.bf16.msra.mxu1 %v1194_v10 }
  0x49   : > { %1044 = vmatprep.subr.bf16.mxu0 %v1331_v0  ;;  %1064 = vmatprep.subr.bf16.mxu1 %v1331_v0 }
  0x4c   : > { %1045 = vmatpush3.bf16.msra.mxu0 %v1187_v7  ;;  %1065 = vmatpush3.bf16.msra.mxu1 %v1195_v12 }
  0x4d   : > { %1046 = vmatprep.subr.bf16.mxu0 %v1331_v0  ;;  %1066 = vmatprep.subr.bf16.mxu1 %v1331_v0 }
  0x50   : > { %1047 = vmatpush3.bf16.msra.mxu0 %v1188_v9  ;;  %1067 = vmatpush3.bf16.msra.mxu1 %v1196_v14 }
  0x51   : > { %1048 = vmatprep.subr.bf16.mxu0 %v1331_v0  ;;  %1068 = vmatprep.subr.bf16.mxu1 %v1331_v0 }
  0x54   : > { %1049 = vmatpush3.bf16.msra.mxu0 %v1189_v11  ;;  %1069 = vmatpush3.bf16.msra.mxu1 %v1197_v16 }
  0x55   : > { %1050 = vmatprep.subr.bf16.mxu0 %v1331_v0  ;;  %1070 = vmatprep.subr.bf16.mxu1 %v1331_v0 }
  0x58   : > { %1051 = vmatpush3.bf16.msra.mxu0 %v1190_v13  ;;  %1071 = vmatpush3.bf16.msra.mxu1 %v1198_v17 }
  0x59   : > { %1076 = vmatprep.subr.bf16.mxu0 %v1331_v0  ;;  %1096 = vmatprep.subr.bf16.mxu1 %v1331_v0 }
  0x5b   : > { %1053 = vmatmul.mubr.bf16.vlgmr.msra.gmra.mxu0 %v322_v15 }
  0x5c   : > { %1092 = vmatprep.mubr.msk.bf16.mxu0 %vm1332_vm0, %v1331_v0  ;;  %1077 = vmatpush3.bf16.msra.mxu0 %v1199_v18 }
  0x5d   : > { %1078 = vmatprep.subr.bf16.mxu0 %v1331_v0 }
  0x60   : > { %1079 = vmatpush3.bf16.msra.mxu0 %v1200_v19 }
  0x61   : > { %1080 = vmatprep.subr.bf16.mxu0 %v1331_v0 }
  0x64   : > { %1081 = vmatpush3.bf16.msra.mxu0 %v1201_v20 }
  0x65   : > { %1082 = vmatprep.subr.bf16.mxu0 %v1331_v0 }
  0x68   : > { %1083 = vmatpush3.bf16.msra.mxu0 %v1202_v21 }
  0x69   : > { %1084 = vmatprep.subr.bf16.mxu0 %v1331_v0 }
  0x6c   : > { %1085 = vmatpush3.bf16.msra.mxu0 %v1203_v22 }
  0x6d   : > { %1086 = vmatprep.subr.bf16.mxu0 %v1331_v0 }
  0x70   : > { %1087 = vmatpush3.bf16.msra.mxu0 %v1204_v23 }
  0x71   : > { %1088 = vmatprep.subr.bf16.mxu0 %v1331_v0 }
  0x74   : > { %1089 = vmatpush3.bf16.msra.mxu0 %v1205_v32 }
  0x75   : > { %1090 = vmatprep.subr.bf16.mxu0 %v1331_v0 }
  0x78   : > { %1091 = vmatpush3.bf16.msra.mxu0 %v1206_v33 }
 0x11b   : > { %v428_v25 = vpop.f32.mrf.mxu0 }
 0x11c   : > { %v429_v26 = vadd.f32 %v926_v24, %v428_v25 }
 0x11d   : > { %v1054_v27 = vpop.f32.mrf.mxu0 }
 0x11e   : > { %v434_v28 = vmax.f32 %v429_v26, 0.0 }
 0x11f   : > { %v431_v29 = vpop.f32.mrf.mxu0 }
 0x120   : > { %v435_v30 = vpack.c.bf16 %v434_v28, %v434_v28 }
 0x121   : > { %v1055_v31 = vpop.f32.mrf.mxu0 }
 0x122   : > { %1073 = vmatmul.mubr.bf16.vlgmr.msra.gmra.mxu1 %v435_v30 }
 0x123   : > { %1112 = vmatprep.mubr.msk.bf16.mxu1 %vm1332_vm0, %v1331_v0  ;;  %1097 = vmatpush3.bf16.msra.mxu1 %v1207_v34 }
 0x124   : > { %1098 = vmatprep.subr.bf16.mxu1 %v1331_v0 }
 0x127   : > { %1099 = vmatpush3.bf16.msra.mxu1 %v1208_v35 }
 0x128   : > { %1100 = vmatprep.subr.bf16.mxu1 %v1331_v0 }
 0x12b   : > { %1101 = vmatpush3.bf16.msra.mxu1 %v1209_v36 }
 0x12c   : > { %1102 = vmatprep.subr.bf16.mxu1 %v1331_v0 }
 0x12f   : > { %1103 = vmatpush3.bf16.msra.mxu1 %v1210_v37 }
 0x130   : > { %1104 = vmatprep.subr.bf16.mxu1 %v1331_v0 }
 0x133   : > { %1105 = vmatpush3.bf16.msra.mxu1 %v1211_v38 }
 0x134   : > { %1106 = vmatprep.subr.bf16.mxu1 %v1331_v0 }
 0x137   : > { %1107 = vmatpush3.bf16.msra.mxu1 %v1212_v39 }
 0x138   : > { %1108 = vmatprep.subr.bf16.mxu1 %v1331_v0 }
 0x13b   : > { %1109 = vmatpush3.bf16.msra.mxu1 %v1213_v48 }
 0x13c   : > { %1110 = vmatprep.subr.bf16.mxu1 %v1331_v0 }
 0x13f   : > { %1111 = vmatpush3.bf16.msra.mxu1 %v1214_v49 }
 0x1e2   : > { %v542_v41 = vpop.f32.mrf.mxu1 }
 0x1e3   : > { %v543_v42 = vadd.f32 %v936_v40, %v542_v41 }
 0x1e4   : > { %v1074_v43 = vpop.f32.mrf.mxu1 }
 0x1e5   : > { %v548_v44 = vmax.f32 %v543_v42, 0.0 }
 0x1e6   : > { %v545_v45 = vpop.f32.mrf.mxu1 }
 0x1e7   : > { %v549_v46 = vpack.c.bf16 %v548_v44, %v548_v44 }
 0x1e8   : > { %v1075_v47 = vpop.f32.mrf.mxu1 }
 0x1e9   : > { %1093 = vmatmul.mubr.bf16.vlgmr.msra.gmra.mxu0 %v549_v46 }
 0x2a9   : > { %v657_v51 = vpop.f32.mrf.mxu0 }
 0x2aa   : > { %v658_v52 = vadd.f32 %v962_v50, %v657_v51 }
 0x2ab   : > { %v1094_v53 = vpop.f32.mrf.mxu0 }
 0x2ac   : > { %v663_v54 = vmax.f32 %v658_v52, 0.0 }
 0x2ad   : > { %v660_v55 = vpop.f32.mrf.mxu0 }
 0x2ae   : > { %v664_v56 = vpack.c.bf16 %v663_v54, %v663_v54 }
 0x2af   : > { %v1095_v57 = vpop.f32.mrf.mxu0 }
 0x2b0   : > { %1113 = vmatmul.mubr.bf16.vlgmr.msra.gmra.mxu1 %v664_v56 }
 0x370   : > { %v772_v59 = vpop.f32.mrf.mxu1 }
 0x371   : > { %v773_v60 = vadd.f32 %v988_v58, %v772_v59 }
 0x372   : > { %v1114_v61 = vpop.f32.mrf.mxu1 }
 0x373   : > { %v778_v62 = vpack.c.bf16 %v773_v60, %v773_v60 }
 0x374   : > { %v775_v63 = vpop.f32.mrf.mxu1 }
 0x375   : > { %779 = vst [vmem:[%s320_s14] sm:$0xf] %v778_v62 }
 0x376   : > { %v1115_v0 = vpop.f32.mrf.mxu1 }
 0x377 PF: > { %s20_s20 = sadd.s32 1, %s1325_s20   ;;  %s1590_s15 = smov %s1309_s16 }
 0x378   : > { %p17_p9 = scmp.ge.s32.totalorder %s20_s20, 4   ;;  %s1591_s16 = smov %s1313_s17 }
 0x379   : > { %s1592_s17 = smov %s1407_s27  ;;  %s1593_s18 = smov %s1321_s19 }
 0x37a   : > { %s1594_s19 = smov %s1596_s22  ;;  %19 = sbr.rel (!%p17_p9) target bundleno = 6 (0x6), region = 100 }
 0x37f   :  { %805 = vsyncpa [#allocation3], 1 }
 0x380   :  { %807 = vsyncpa [#allocation3 + $0x1], 1 }
 0x381   :  { %808 = vsyncpa [#allocation5], 1 }
 0x382   :  { %810 = vsyncpa [#allocation5 + $0x1], 1 }

</bundles_post_ra>
